<compile_context>
chip_gen: v5e
topology: v5e:2x2
jax: 0.10.0
libtpu: 0.0.40
codegen_flags: <defaults>
</compile_context>

<pallas_src>
import functools

import jax
import jax.numpy as jnp
from jax.experimental import pallas as pl
from jax.experimental.pallas import tpu as pltpu


# ---------------------------------------------------------------------------
# Shared excite math (FC -> SiLU -> FC -> Sigmoid), f32 accumulation.
# ---------------------------------------------------------------------------
def _excite(m, w1, b1, w2, b2):
    h = jnp.dot(m, w1, preferred_element_type=jnp.float32) + b1
    h = h * jax.nn.sigmoid(h)                                   # SiLU
    return jax.nn.sigmoid(jnp.dot(h, w2, preferred_element_type=jnp.float32) + b2)


# ---------------------------------------------------------------------------
# Main fused single-pass kernel: squeeze + excite + scale for nb batch elements.
# ---------------------------------------------------------------------------
def _se_fused_kernel(x_ref, w1_ref, b1_ref, w2_ref, b2_ref, o_ref, *, inv_hw):
    x = x_ref[...]                                              # (nb, C, HW), input dtype
    # Squeeze: spatial mean with f32 accumulation (no full-block f32 upcast).
    m = jnp.sum(x, axis=2, dtype=jnp.float32) * inv_hw          # (nb, C)
    # Excite: tiny FCs, f32.
    s = _excite(m, w1_ref[...], b1_ref[...], w2_ref[...], b2_ref[...])   # (nb, C)
    # Scale: gate in the input dtype (cheap bf16 VALU path on v6e/v7x).
    o_ref[...] = x * s.astype(o_ref.dtype)[:, :, None]


# ---------------------------------------------------------------------------
# Fallback kernels for huge per-batch feature maps: HW-chunked reduction pass
# producing the gate s, then a gating pass.
# ---------------------------------------------------------------------------
def _se_squeeze_excite_kernel(x_ref, w1_ref, b1_ref, w2_ref, b2_ref, s_ref,
                              acc_ref, *, inv_hw):
    k = pl.program_id(1)

    @pl.when(k == 0)
    def _():
        acc_ref[...] = jnp.zeros_like(acc_ref)

    acc_ref[...] += jnp.sum(x_ref[...], axis=2, dtype=jnp.float32)      # (1, C)

    @pl.when(k == pl.num_programs(1) - 1)
    def _():
        m = acc_ref[...] * inv_hw                                        # (1, C)
        s = _excite(m, w1_ref[...], b1_ref[...], w2_ref[...], b2_ref[...])
        s_ref[...] = s[:, :, None]                                       # (1, C, 1) f32


def _se_gate_kernel(x_ref, s_ref, o_ref):
    o_ref[...] = x_ref[...] * s_ref[...].astype(o_ref.dtype)            # bcast (1,C,1)


# ---------------------------------------------------------------------------
# Sizing helpers.
# ---------------------------------------------------------------------------
def _vmem_budget():
    """Per-generation VMEM sizing.

    limit  = half of physical VMEM (64 MiB on 128-MiB v5e/v6e, 32 MiB on 64-MiB v7x)
    budget = 3/4 of the limit, reserved for live double-buffered in/out blocks.
    """
    default_cap = 64 * 1024 * 1024  # conservative fallback, safe on every generation
    try:
        cap = int(getattr(pltpu.get_tpu_info(), "vmem_capacity_bytes", default_cap))
    except Exception:
        cap = default_cap
    limit = min(cap // 2, 96 * 1024 * 1024)
    budget = (limit * 3) // 4
    return budget, limit


def _pick_nb(N, per_batch_block_bytes, budget_bytes):
    """Largest divisor of N whose double-buffered in+out blocks fit the budget.

    Prefers an even number of grid steps (even split over v7x's 2 TensorCores
    with dimension_semantics=("parallel",); neutral on single-core v5e/v6e).
    Returns None when even nb=1 does not fit -> caller uses the chunked fallback.
    """
    fits = [d for d in range(1, N + 1)
            if N % d == 0 and 4 * d * per_batch_block_bytes <= budget_bytes]
    if not fits:
        return None
    if N >= 2:
        even_grid = [d for d in fits if (N // d) % 2 == 0]
        if even_grid:
            return max(even_grid)
    return max(fits)


# ---------------------------------------------------------------------------
# Wrappers.
# ---------------------------------------------------------------------------
def _se_forward_fused(x2, w1, b1, w2, b2, nb, HW, itemsize, vmem_limit):
    N, C, _ = x2.shape
    Cr = w1.shape[1]
    kernel = functools.partial(_se_fused_kernel, inv_hw=1.0 / float(HW))
    ce = pl.CostEstimate(
        flops=2 * N * C * HW + 4 * N * C * Cr,
        transcendentals=N * (C + 2 * Cr),
        bytes_accessed=2 * N * C * HW * itemsize,
    )
    # NOTE: input_output_aliases={0: 0} would make this an in-place gate when the
    # caller donates x (memory win only); left off so x stays usable afterwards.
    return pl.pallas_call(
        kernel,
        out_shape=jax.ShapeDtypeStruct((N, C, HW), x2.dtype),
        grid_spec=pl.GridSpec(
            grid=(N // nb,),
            in_specs=[
                pl.BlockSpec((nb, C, HW), lambda n: (n, 0, 0)),  # x: full (C, HW) extent
                pl.BlockSpec((C, Cr), lambda n: (0, 0)),         # w1 (resident)
                pl.BlockSpec((1, Cr), lambda n: (0, 0)),         # b1
                pl.BlockSpec((Cr, C), lambda n: (0, 0)),         # w2
                pl.BlockSpec((1, C), lambda n: (0, 0)),          # b2
            ],
            out_specs=pl.BlockSpec((nb, C, HW), lambda n: (n, 0, 0)),
        ),
        compiler_params=pltpu.CompilerParams(
            dimension_semantics=("parallel",),
            vmem_limit_bytes=vmem_limit,
        ),
        cost_estimate=ce,
    )(x2, w1, b1, w2, b2)


def _se_forward_chunked(x2, w1, b1, w2, b2, HW, itemsize, budget, vmem_limit):
    """Fallback when a single batch element's (C, HW) slab exceeds the VMEM budget.

    Two passes over x (unavoidable once the slab no longer fits on-chip):
      pass 1: HW-chunked squeeze reduction + excite -> gate s of shape (N, C, 1)
      pass 2: HW-chunked gating multiply.
    """
    N, C, _ = x2.shape
    Cr = w1.shape[1]

    hwc = max(128, (budget // (4 * C * itemsize)) // 128 * 128)
    hwc = int(min(hwc, pl.cdiv(HW, 128) * 128))
    K = pl.cdiv(HW, hwc)
    HWp = K * hwc
    if HWp != HW:
        # Pad HW so every chunk block is in-bounds (only in this rare fallback).
        # TODO(synk): mask the tail chunk in-kernel instead of padding in HBM.
        x2 = jnp.pad(x2, ((0, 0), (0, 0), (0, HWp - HW)))

    inv_hw = 1.0 / float(HW)

    s = pl.pallas_call(
        functools.partial(_se_squeeze_excite_kernel, inv_hw=inv_hw),
        out_shape=jax.ShapeDtypeStruct((N, C, 1), jnp.float32),
        grid_spec=pltpu.PrefetchScalarGridSpec(
            num_scalar_prefetch=0,
            grid=(N, K),
            in_specs=[
                pl.BlockSpec((1, C, hwc), lambda n, k: (n, 0, k)),
                pl.BlockSpec((C, Cr), lambda n, k: (0, 0)),
                pl.BlockSpec((1, Cr), lambda n, k: (0, 0)),
                pl.BlockSpec((Cr, C), lambda n, k: (0, 0)),
                pl.BlockSpec((1, C), lambda n, k: (0, 0)),
            ],
            out_specs=pl.BlockSpec((1, C, 1), lambda n, k: (n, 0, 0)),
            scratch_shapes=[pltpu.VMEM((1, C), jnp.float32)],
        ),
        compiler_params=pltpu.CompilerParams(
            dimension_semantics=("parallel", "arbitrary"),
            vmem_limit_bytes=vmem_limit,
        ),
    )(x2, w1, b1, w2, b2)

    out = pl.pallas_call(
        _se_gate_kernel,
        out_shape=jax.ShapeDtypeStruct((N, C, HWp), x2.dtype),
        grid_spec=pl.GridSpec(
            grid=(N, K),
            in_specs=[
                pl.BlockSpec((1, C, hwc), lambda n, k: (n, 0, k)),
                pl.BlockSpec((1, C, 1), lambda n, k: (n, 0, 0)),
            ],
            out_specs=pl.BlockSpec((1, C, hwc), lambda n, k: (n, 0, k)),
        ),
        compiler_params=pltpu.CompilerParams(
            dimension_semantics=("parallel", "parallel"),
            vmem_limit_bytes=vmem_limit,
        ),
        cost_estimate=pl.CostEstimate(
            flops=N * C * HWp,
            transcendentals=0,
            bytes_accessed=(2 * N * C * HWp + N * C) * itemsize,
        ),
    )(x2, s)

    if HWp != HW:
        out = out[:, :, :HW]
    return out


def se_forward(x, w1, b1, w2, b2, *, vmem_budget_bytes=None, vmem_limit_bytes=None):
    """SE forward.  x: (N, C, H, W); w1: (C, Cr); b1: (1, Cr); w2: (Cr, C); b2: (1, C)."""
    N, C, H, W = x.shape
    HW = H * W
    itemsize = jnp.dtype(x.dtype).itemsize

    budget, limit = _vmem_budget()
    if vmem_budget_bytes is not None:
        budget = int(vmem_budget_bytes)
    if vmem_limit_bytes is not None:
        limit = int(vmem_limit_bytes)

    x2 = x.reshape(N, C, HW)                      # metadata-only reshape, no copy / pad
    nb = _pick_nb(N, C * HW * itemsize, budget)

    if nb is None:
        out2 = _se_forward_chunked(x2, w1, b1, w2, b2, HW, itemsize, budget, limit)
    else:
        out2 = _se_forward_fused(x2, w1, b1, w2, b2, nb, HW, itemsize, limit)

    return out2.reshape(N, C, H, W)


def se_reference(x, w1, b1, w2, b2):
    m = jnp.mean(x, axis=(2, 3))                                         # (N, C)
    h = jnp.dot(m, w1, preferred_element_type=jnp.float32) + b1
    h = h * jax.nn.sigmoid(h)
    s = jax.nn.sigmoid(jnp.dot(h, w2, preferred_element_type=jnp.float32) + b2)
    return x * s[:, :, None, None]


if __name__ == "__main__":
    # Module config: SE(ch=16, r=1) -> hidden = ch // (4*r) = 4.
    N, C, H, W = 2, 16, 16, 16
    r = 1
    Cr = C // (4 * r)

    key = jax.random.PRNGKey(0)
    kx, kw1, kb1, kw2, kb2, kx2 = jax.random.split(key, 6)

    x = jax.random.normal(kx, (N, C, H, W), dtype=jnp.float32)
    # Conv2d(ch_in, ch_out, 1) on a 1x1 map == (ch_in, ch_out) FC matrices.
    w1 = jax.random.normal(kw1, (C, Cr), dtype=jnp.float32) * 0.1
    b1 = jax.random.normal(kb1, (1, Cr), dtype=jnp.float32) * 0.1
    w2 = jax.random.normal(kw2, (Cr, C), dtype=jnp.float32) * 0.1
    b2 = jax.random.normal(kb2, (1, C), dtype=jnp.float32) * 0.1

    ref = se_reference(x, w1, b1, w2, b2)
    # Tolerance covers MXU default-precision f32 matmul rounding differences.
    TOL = dict(atol=1e-3, rtol=1e-3)

    # 1) Main fused single-pass path (auto VMEM sizing, no HBM pad/slice round-trips).
    out = jax.block_until_ready(se_forward(x, w1, b1, w2, b2))
    assert out.shape == (N, C, H, W)
    assert jnp.allclose(out, ref, **TOL), "fused path mismatch vs reference"

    # 2) HW not a multiple of 128 and odd batch: full-extent last dim, no padding.
    xb = jax.random.normal(kx2, (3, C, 10, 10), dtype=jnp.float32)
    outb = jax.block_until_ready(se_forward(xb, w1, b1, w2, b2))
    assert jnp.allclose(outb, se_reference(xb, w1, b1, w2, b2), **TOL), \
        "odd-HW path mismatch vs reference"

    # 3) Force the HW-chunked fallback (as if one batch slab exceeded the budget).
    outc = jax.block_until_ready(
        se_forward(x, w1, b1, w2, b2, vmem_budget_bytes=4 * C * 128 * 4))
    assert jnp.allclose(outc, ref, **TOL), "chunked fallback mismatch vs reference"

    print("KERNEL_OK")
</pallas_src>

<mosaic_0001>
module attributes {stable_mosaic.version = 11 : i64} {
  func.func @_se_fused_kernel(%arg0: i32, %arg1: memref<1x16x256xf32, #tpu.memory_space<vmem>>, %arg2: memref<16x4xf32, #tpu.memory_space<vmem>>, %arg3: memref<1x4xf32, #tpu.memory_space<vmem>>, %arg4: memref<4x16xf32, #tpu.memory_space<vmem>>, %arg5: memref<1x16xf32, #tpu.memory_space<vmem>>, %arg6: memref<1x16x256xf32, #tpu.memory_space<vmem>>) attributes {dimension_semantics = [#tpu.dimension_semantics<parallel>], iteration_bounds = array<i64: 2>, scalar_prefetch = 0 : i64, scratch_operands = 0 : i64, tpu.core_type = #tpu.core_type<tc>, window_params = [{transform_indices = @transform_0, window_bounds = array<i64: 1, 16, 256>}, {pipeline_mode = #tpu.pipeline_mode<synchronous>, transform_indices = @transform_1, window_bounds = array<i64: 16, 4>}, {pipeline_mode = #tpu.pipeline_mode<synchronous>, transform_indices = @transform_2, window_bounds = array<i64: 1, 4>}, {pipeline_mode = #tpu.pipeline_mode<synchronous>, transform_indices = @transform_3, window_bounds = array<i64: 4, 16>}, {pipeline_mode = #tpu.pipeline_mode<synchronous>, transform_indices = @transform_4, window_bounds = array<i64: 1, 16>}, {transform_indices = @transform_5, window_bounds = array<i64: 1, 16, 256>}]} {
    %c0 = arith.constant 0 : index
    %c0_0 = arith.constant 0 : index
    %c0_1 = arith.constant 0 : index
    %0 = vector.load %arg1[%c0, %c0_0, %c0_1] : memref<1x16x256xf32, #tpu.memory_space<vmem>>, vector<1x16x256xf32>
    %cst = arith.constant dense<0.000000e+00> : vector<1x16xf32>
    %1 = vector.multi_reduction <add>, %0, %cst [2] : vector<1x16x256xf32> to vector<1x16xf32>
    %cst_2 = arith.constant 3.906250e-03 : f32
    %2 = vector.broadcast %cst_2 : f32 to vector<1x16xf32>
    %3 = arith.mulf %1, %2 : vector<1x16xf32>
    %c0_3 = arith.constant 0 : index
    %c0_4 = arith.constant 0 : index
    %4 = vector.load %arg2[%c0_3, %c0_4] : memref<16x4xf32, #tpu.memory_space<vmem>>, vector<16x4xf32>
    %c0_5 = arith.constant 0 : index
    %c0_6 = arith.constant 0 : index
    %5 = vector.load %arg3[%c0_5, %c0_6] : memref<1x4xf32, #tpu.memory_space<vmem>>, vector<1x4xf32>
    %c0_7 = arith.constant 0 : index
    %c0_8 = arith.constant 0 : index
    %6 = vector.load %arg4[%c0_7, %c0_8] : memref<4x16xf32, #tpu.memory_space<vmem>>, vector<4x16xf32>
    %c0_9 = arith.constant 0 : index
    %c0_10 = arith.constant 0 : index
    %7 = vector.load %arg5[%c0_9, %c0_10] : memref<1x16xf32, #tpu.memory_space<vmem>>, vector<1x16xf32>
    %cst_11 = arith.constant dense<0.000000e+00> : vector<1x4xf32>
    %8 = tpu.matmul %3, %4, %cst_11 {dimension_numbers = #tpu.dot_dimension_numbers<[1], [0], [0], [1], [0, 0, 1, 1], [], []>} : vector<1x16xf32>, vector<16x4xf32>, vector<1x4xf32> -> vector<1x4xf32>
    %9 = arith.addf %8, %5 : vector<1x4xf32>
    %10 = arith.negf %9 : vector<1x4xf32>
    %11 = math.exp %10 : vector<1x4xf32>
    %cst_12 = arith.constant 1.000000e+00 : f32
    %12 = vector.broadcast %cst_12 : f32 to vector<1x4xf32>
    %13 = arith.addf %12, %11 : vector<1x4xf32>
    %14 = arith.divf %12, %13 : vector<1x4xf32>
    %15 = arith.mulf %9, %14 : vector<1x4xf32>
    %cst_13 = arith.constant dense<0.000000e+00> : vector<1x16xf32>
    %16 = tpu.matmul %15, %6, %cst_13 {dimension_numbers = #tpu.dot_dimension_numbers<[1], [0], [0], [1], [0, 0, 1, 1], [], []>} : vector<1x4xf32>, vector<4x16xf32>, vector<1x16xf32> -> vector<1x16xf32>
    %17 = arith.addf %16, %7 : vector<1x16xf32>
    %18 = arith.negf %17 : vector<1x16xf32>
    %19 = math.exp %18 : vector<1x16xf32>
    %cst_14 = arith.constant 1.000000e+00 : f32
    %20 = vector.broadcast %cst_14 : f32 to vector<1x16xf32>
    %21 = arith.addf %20, %19 : vector<1x16xf32>
    %22 = arith.divf %20, %21 : vector<1x16xf32>
    %23 = vector.shape_cast %22 : vector<1x16xf32> to vector<1x16x1xf32>
    %24 = vector.broadcast %23 : vector<1x16x1xf32> to vector<1x16x256xf32>
    %25 = arith.mulf %0, %24 : vector<1x16x256xf32>
    %c0_15 = arith.constant 0 : index
    %c0_16 = arith.constant 0 : index
    %c0_17 = arith.constant 0 : index
    %26 = vector.load %arg6[%c0_15, %c0_16, %c0_17] : memref<1x16x256xf32, #tpu.memory_space<vmem>>, vector<1x16x256xf32>
    tpu.vector_store %arg6[%c0_15, %c0_16, %c0_17], %25 {strides = array<i32>} : memref<1x16x256xf32, #tpu.memory_space<vmem>>, vector<1x16x256xf32>,
    return
  }
  func.func @transform_0(%arg0: i32) -> (i32, i32, i32) {
    %c0_i32 = arith.constant 0 : i32
    %c0_i32_0 = arith.constant 0 : i32
    %c0_i32_1 = arith.constant 0 : i32
    return %arg0, %c0_i32, %c0_i32_0 : i32, i32, i32
  }
  func.func @transform_1(%arg0: i32) -> (i32, i32) {
    %c0_i32 = arith.constant 0 : i32
    %c0_i32_0 = arith.constant 0 : i32
    %c0_i32_1 = arith.constant 0 : i32
    return %c0_i32, %c0_i32_0 : i32, i32
  }
  func.func @transform_2(%arg0: i32) -> (i32, i32) {
    %c0_i32 = arith.constant 0 : i32
    %c0_i32_0 = arith.constant 0 : i32
    %c0_i32_1 = arith.constant 0 : i32
    return %c0_i32, %c0_i32_0 : i32, i32
  }
  func.func @transform_3(%arg0: i32) -> (i32, i32) {
    %c0_i32 = arith.constant 0 : i32
    %c0_i32_0 = arith.constant 0 : i32
    %c0_i32_1 = arith.constant 0 : i32
    return %c0_i32, %c0_i32_0 : i32, i32
  }
  func.func @transform_4(%arg0: i32) -> (i32, i32) {
    %c0_i32 = arith.constant 0 : i32
    %c0_i32_0 = arith.constant 0 : i32
    %c0_i32_1 = arith.constant 0 : i32
    return %c0_i32, %c0_i32_0 : i32, i32
  }
  func.func @transform_5(%arg0: i32) -> (i32, i32, i32) {
    %c0_i32 = arith.constant 0 : i32
    %c0_i32_0 = arith.constant 0 : i32
    %c0_i32_1 = arith.constant 0 : i32
    return %arg0, %c0_i32, %c0_i32_0 : i32, i32, i32
  }
}

</mosaic_0001>

<bundles_post_ra>
// kernel: tpu_custom_call.1
= control target key start
LH: loop header
LB: loop body
LE: loop exit
PB: predicated region body
PF: predicated region fallthrough
CT: control target
= control target key end

     0   :  { %10 = vsyncpa [#allocation3], 0  ;;  %s847_s0 = inlined_call_operand.hbm [shape: f32[2,16,256], index: 0, kind: input, shape index: {}]   ;;  %s848_s1 = inlined_call_operand.vmem [shape: f32[16,4], index: 1, kind: input, shape index: {}]   ;;  %s849_s2 = inlined_call_operand.vmem [shape: f32[1,4], index: 2, kind: input, shape index: {}]   ;;  %s850_s3 = inlined_call_operand.vmem [shape: f32[4,16], index: 3, kind: input, shape index: {}]   ;;  %s851_s4 = inlined_call_operand.vmem [shape: f32[1,16], index: 4, kind: input, shape index: {}]   ;;  %s852_s5 = inlined_call_operand.hbm [shape: f32[2,16,256], index: 5, kind: output, shape index: {}]  }
   0x1   :  { %12 = vsyncpa [#allocation3 + $0x1], 0 }
   0x2   :  { %13 = vsyncpa [#allocation4], 0 }
   0x3   :  { %15 = vsyncpa [#allocation4 + $0x1], 0  ;;  %s685_s18 = smov 0   ;;  %s687_s19 = smov 0  }
   0x4   :  { %s689_s20 = smov 0   ;;  %s691_s21 = smov 0  }
   0x5 LB: > { %s706_s22 = sadd.s32 4294967295, %s649_s21   ;;  %s471_s23 = sadd.s32 4294967294, %s649_s21   ;;  %s649_s21 = sphi %s691_s21, %s862_s21   ;;  %s645_s20 = sphi %s689_s20, %s861_s20   ;;  %s641_s19 = sphi %s687_s19, %s860_s19   ;;  %s637_s18 = sphi %s685_s18, %s859_s18  }
   0x6   : > { %s710_s24 = sadd.s32 1, %s649_s21   ;;  %s28_s25 = sadd.s32 1, %s645_s20 }
   0x7   : > { %s25_s26 = ssub.s32 %s649_s21, %s710_s24  ;;  %p35_p0 = scmp.ne.s32.totalorder %s645_s20, %s641_s19 }
   0x8   : > { %p26_p1 = scmp.eq.s32.totalorder %s25_s26, 0  ;;  %p36_p2 = scmp.eq.s32.totalorder %s649_s21, 0 }
   0x9   : > { %p41_p3 = scmp.ne.s32.totalorder %s641_s19, %s637_s18  ;;  %p42_p4 = scmp.eq.s32.totalorder %s706_s22, 0 }
   0xa   : > { %s722_s27 = scalar_select %p26_p1, %s645_s20, %s28_s25  }
   0xb   : > { %p724_p5 = por %p36_p2, %p35_p0  ;;  %p728_p6 = por %p42_p4, %p41_p3 }
   0xc   : > { %p149_p7 = scmp.eq.s32.totalorder %s706_s22, 1  ;;  %p155_p8 = scmp.eq.s32.totalorder %s471_s23, 1 }
   0xd   : > { %p504_p10 = scmp.lt.s32.totalorder %s649_s21, 2  ;;  %s187_s7 = sand.u32 1, %s645_s20  }
   0xe   : > { %p735_p11 = por %p149_p7, %p35_p0  ;;  %p739_p12 = por %p155_p8, %p41_p3 }
   0xf   : > { %s490_s8 = sshll.u32 %s649_s21, 5  ;;  %s474_s9 = sshll.u32 %s187_s7, 5 }
  0x10   : > { %s196_s12 = scalar_lea.hbm %s847_s0, %s490_s8  ;;  %s191_s14 = scalar_lea.vmem [#allocation2], %s474_s9 }
  0x11   : > { %s197_s13 = sshll.u32 %s196_s12, 4  ;;  %s199_s15 = sshll.u32 %s191_s14, 4  ;;  %s198_s13 = int_to_ptr.hbm [resolvable:$true] %s197_s13  ;;  %s200_s15 = int_to_ptr.vmem [resolvable:$true] %s199_s15 }
  0x12   : > { %p750_p13 = pnand %p504_p10, %p724_p5  ;;  %p477_p0 = scmp.ge.s32.totalorder %s649_s21, 1 }
  0x13   : > { %p207_p1 = scmp.lt.s32.totalorder %s649_s21, 3  ;;  %s188_s17 = scalar_lea.sflag [#allocation3], %s187_s7 }
  0x14   : > { %s553_s23 = sshra.s32 %s198_s13, 4  ;;  %p557_p3 = pneg %p750_p13  ;;  %s554_s23 = int_to_ptr.hbm [resolvable:$true] %s553_s23 }
  0x15   : > { %s555_s25 = scalar_lea.hbm %s554_s23, 32  ;;  %s560_s28 = scalar_lea.hbm %s847_s0, 64 }
  0x16   : > { %p556_p2 = scmp.ne.s32.totalorder %s554_s23, %s555_s25  ;;  %p561_p5 = scmp.lt.s32.totalorder %s554_s23, %s847_s0 }
  0x17   : > { %p562_p8 = scmp.lt.s32.totalorder %s560_s28, %s555_s25 }
  0x18   : > { %p558_p4 = pnand %p557_p3, %p556_p2 }
  0x19   : > { %p563_p10 = por %p562_p8, %p561_p5 }
  0x1a   : > { %p559_p7 = pneg %p558_p4 }
  0x1c   : > { %p564_p9 = pnand %p563_p10, %p559_p7 }
  0x1e   : > { %567 = shalt.err (!%p564_p9)
}
  0x1f   : > { %s651_s7 = smov 256   ;;  %s652_s11 = smov 16  }
  0x20   : > { %499 = dma.hbm_to_vmem [thread:$0]  (!%p750_p13), %s198_s13, 512, %s200_s15, %s188_s17, %s651_s7, %s651_s7, %s652_s11  }
  0x21   : > { %p208_p2 = pnand %p477_p0, %p207_p1 }
  0x22   : > { %s771_s12 = sand.u32 (!%p208_p2), 1, %s641_s19  }
  0x23   : > { %211 = sbr.rel (%p208_p2) target bundleno = 627 (0x273), region = 40  ;;  %s478_s14 = sshll.u32 (!%p208_p2), %s771_s12, 5 }
  0x24   : > { %s214_s23 = scalar_lea.sflag (!%p208_p2), [#allocation3], %s771_s12  ;;  %s217_s25 = scalar_lea.vmem (!%p208_p2), [#allocation2], %s478_s14 }
  0x28   : > { %628 = dma.done.wait (%p728_p6), %s214_s23, 512  }
  0x29   : > { %630 = vsyncadd (%p728_p6), %s214_s23, 4294966784  ;;  %v781_v0 = vld [vmem:[%s217_s25] sm:$0xff]  ;;  %v783_v1 = vld [vmem:[%s217_s25 + $0x8] sm:$0xff]  ;;  %v264_v9 = vlaneseq  ;;  %vm269_vm0 = vcmask 130112   ;;  %vm271_vm1 = vcmask 130048   ;;  %vm318_vm2 = vcmask 1043456  }
  0x2a   : > { %v249_v2 = vadd.f32 %v783_v1, %v781_v0  ;;  %v787_v3 = vld [vmem:[%s217_s25 + $0x10] sm:$0xff]  ;;  %v789_v4 = vld [vmem:[%s217_s25 + $0x18] sm:$0xff]  ;;  %v258_v6 = vld [vmem:[%s848_s1 + $0x8] sm:$0xff]  ;;  %vm314_vm7 = vcmask 31744   ;;  %s244_s7 = scalar_lea.vmem [#allocation5], %s478_s14  ;;  %s491_s11 = sshll.u32 %s706_s22, 5 }
  0x2b   : > { %v252_v5 = vadd.f32 %v789_v4, %v787_v3  ;;  %288 = vmatpush.msra.mxu0 %v258_v6  ;;  %v257_v7 = vld [vmem:[%s848_s1] sm:$0xff]  ;;  %v265_v10 = vand.u32 127, %v264_v9  ;;  %v363_v36 = vshrl.u32 %v264_v9, 7  ;;  %s394_s13 = scalar_lea.hbm %s852_s5, %s491_s11  ;;  %s395_s15 = sshll.u32 %s244_s7, 4  ;;  %s396_s15 = int_to_ptr.vmem [resolvable:$true] %s395_s15 }
  0x2c   : > { %250 = vadd.xlane.f32.xlu0 %v249_v2  ;;  %v259_v18 = vld [vmem:[%s849_s2] sm:$0x1]  ;;  %s397_s29 = sshll.u32 %s394_s13, 4  ;;  %s383_s14 = scalar_lea.sflag [#allocation4], %s771_s12  ;;  %s398_s29 = int_to_ptr.hbm [resolvable:$true] %s397_s29 }
  0x2d   : > { %289 = vmatpush.msra.mxu0 %v257_v7  ;;  %v267_v12 = vadd.s32 4294967288, %v265_v10  ;;  %v260_v19 = vld [vmem:[%s850_s3] sm:$0xf]  ;;  %542 = vset.pattern.permute.xlu1 %v363_v36  ;;  %v370_v37 = vadd.s32 8, %v363_v36  ;;  %s597_s16 = sshra.s32 %s398_s29, 4  ;;  %s603_s8 = scalar_lea.hbm %s852_s5, 64  ;;  %s598_s16 = int_to_ptr.hbm [resolvable:$true] %s597_s16 }
  0x2e   : > { %482 = vmatpush.msk.msra.mxu1 %vm318_vm2, %v260_v19  ;;  %v261_v38 = vld [vmem:[%s851_s4] sm:$0x1]  ;;  %s599_s22 = scalar_lea.hbm %s598_s16, 32  ;;  %p604_p0 = scmp.lt.s32.totalorder %s598_s16, %s852_s5 }
  0x2f   : > { %544 = vset.pattern.permute.xlu0 %v370_v37  ;;  %p600_p6 = scmp.ne.s32.totalorder %s598_s16, %s599_s22  ;;  %p605_p1 = scmp.lt.s32.totalorder %s603_s8, %s599_s22 }
  0x31   : > { %p601_p9 = pnand %p600_p6, %p735_p11  ;;  %p606_p3 = por %p605_p1, %p604_p0 }
  0x33   : > { %p602_p13 = pneg %p601_p9 }
  0x34   : > { %253 = vadd.xlane.f32.xlu0 %v252_v5 }
  0x35   : > { %p607_p4 = pnand %p606_p3, %p602_p13 }
  0x9f   : > { %v251_v8 = vpop.xlane.xlu0 %250 }
  0xa0   : > { %v255_v11 = vmul.f32 0.00390625, %v251_v8 }
  0xa2   : > { %v266_v15 = vperm.slane %v255_v11, %v265_v10 }
  0xa7   : > { %v254_v13 = vpop.xlane.xlu0 %253 }
  0xa8   : > { %v256_v14 = vmul.f32 0.00390625, %v254_v13 }
  0xaa   : > { %v268_v16 = vperm.slane %v256_v14, %v267_v12 }
  0xac   : > { %v270_v17 = vsel %vm269_vm0, %v268_v16, %v266_v15 }
  0xad   : > { %480 = vmatmul.msk.f32.vlgmr.msra.gmra.mxu0 %vm271_vm1, %v270_v17 }
 0x12a   : > { %v291_v20 = vpop.f32.mrf.mxu0 }
 0x12b   : > { %v292_v21 = vadd.f32 %v291_v20, %v259_v18 }
 0x12d   : > { %v481_v22 = vmul.f32 -1.442695, %v292_v21 }
 0x12f   : > { %545 = vpow2.f32 %v481_v22 }
 0x135   : > { %v546_v23 = vpop.eup %545 }
 0x136   : > { %v297_v24 = vadd.f32 1.0, %v546_v23 }
 0x138   : > { %547 = vrcp.f32 %v297_v24  ;;  %v309_v28 = vand.u32 2147483648, %v297_v24  ;;  %v307_v30 = vand.u32 2147483647, %v297_v24  ;;  %vm303_vm4 = vweird.f32 %v297_v24 }
 0x13a   : > { %v310_v32 = vor.u32 1.1754944e-38, %v309_v28  ;;  %vm308_vm6 = vcmp.eq.f32.partialorder %v307_v30, 8.507059e+37 }
 0x13e   : > { %v548_v25 = vpop.eup %547 }
 0x13f   : > { %v299_v26 = vmul.f32 %v548_v25, %v297_v24  ;;  %vm304_vm3 = vweird.f32 %v548_v25 }
 0x140   : > { %vm305_vm5 = vmor %vm303_vm4, %vm304_vm3 }
 0x141   : > { %v300_v27 = vsub.f32 1.0, %v299_v26 }
 0x143   : > { %v301_v29 = vmul.f32 %v548_v25, %v300_v27 }
 0x145   : > { %v302_v31 = vadd.f32 %v548_v25, %v301_v29 }
 0x147   : > { %v306_v33 = vsel %vm305_vm5, %v548_v25, %v302_v31 }
 0x148   : > { %v311_v34 = vsel %vm308_vm6, %v310_v32, %v306_v33 }
 0x149   : > { %v313_v35 = vmul.f32 %v311_v34, %v292_v21 }
 0x14b   : > { %483 = vmatmul.msk.f32.vlgmr.msra.gmra.mxu1 %vm314_vm7, %v313_v35 }
 0x1c8   : > { %v339_v39 = vpop.f32.mrf.mxu1 }
 0x1c9   : > { %v340_v40 = vadd.f32 %v339_v39, %v261_v38 }
 0x1cb   : > { %v484_v41 = vmul.f32 -1.442695, %v340_v40 }
 0x1cd   : > { %549 = vpow2.f32 %v484_v41 }
 0x1d3   : > { %v550_v42 = vpop.eup %549 }
 0x1d4   : > { %v345_v43 = vadd.f32 1.0, %v550_v42 }
 0x1d6   : > { %551 = vrcp.f32 %v345_v43  ;;  %v357_v47 = vand.u32 2147483648, %v345_v43  ;;  %v355_v49 = vand.u32 2147483647, %v345_v43  ;;  %vm351_vm9 = vweird.f32 %v345_v43 }
 0x1d8   : > { %v358_v51 = vor.u32 1.1754944e-38, %v357_v47  ;;  %vm356_vm11 = vcmp.eq.f32.partialorder %v355_v49, 8.507059e+37 }
 0x1dc   : > { %v552_v44 = vpop.eup %551 }
 0x1dd   : > { %v347_v45 = vmul.f32 %v552_v44, %v345_v43  ;;  %vm352_vm8 = vweird.f32 %v552_v44 }
 0x1de   : > { %vm353_vm10 = vmor %vm351_vm9, %vm352_vm8 }
 0x1df   : > { %v348_v46 = vsub.f32 1.0, %v347_v45 }
 0x1e1   : > { %v349_v48 = vmul.f32 %v552_v44, %v348_v46 }
 0x1e3   : > { %v350_v50 = vadd.f32 %v552_v44, %v349_v48 }
 0x1e5   : > { %v354_v52 = vsel %vm353_vm10, %v552_v44, %v350_v50 }
 0x1e6   : > { %v359_v53 = vsel %vm356_vm11, %v358_v51, %v354_v52 }
 0x1e7   : > { %v361_v54 = vperm.slane %v359_v53, 0 }
 0x1e9   : > { %366 = vperm.xlu1 %542, %v361_v54  }
 0x1f1   : > { %543 = vset.pattern.permute.xlu1 %v370_v37 }
 0x1f9   : > { %372 = vperm.xlu1 %543, %v361_v54  }
 0x25b   : > { %v367_v55 = vpop.permute.xlu1 %366 }
 0x25c   : > { %v374_v56 = vmul.f32 %v367_v55, %v781_v0  ;;  %v375_v57 = vmul.f32 %v367_v55, %v783_v1 }
 0x25e   : > { %378 = vst [vmem:[%s244_s7] sm:$0xff] %v374_v56 }
 0x25f   : > { %379 = vst [vmem:[%s244_s7 + $0x8] sm:$0xff] %v375_v57 }
 0x26b   : > { %v373_v58 = vpop.permute.xlu1 %372 }
 0x26c   : > { %v376_v59 = vmul.f32 %v373_v58, %v787_v3  ;;  %v377_v60 = vmul.f32 %v373_v58, %v789_v4 }
 0x26e   : > { %380 = vst [vmem:[%s244_s7 + $0x10] sm:$0xff] %v376_v59 }
 0x26f   : > { %381 = vst [vmem:[%s244_s7 + $0x18] sm:$0xff] %v377_v60 }
 0x270   : > { %610 = shalt.err (!%p607_p4)
}
 0x271   : > { %s653_s12 = smov 256   ;;  %s654_s10 = smov 16  }
 0x272   : > { %494 = dma.vmem_to_hbm [thread:$0]  (%p735_p11), %s396_s15, 512, %s398_s29, %s383_s14, %s653_s12, %s653_s12, %s654_s10  }
 0x273 PF: > { %s412_s7 = sand.u32 1, %s637_s18   ;;  %p858_p7 = scmp.ge.s32.totalorder %s649_s21, 2 }
 0x274   : > { %s413_s11 = scalar_lea.sflag [#allocation4], %s412_s7 }
 0x275   : > { %p501_p5 = pnand %p858_p7, %p739_p12 }
 0x277   : > { %p502_p8 = pneg %p501_p5 }
 0x279   : > { %632 = dma.done.wait (%p502_p8), %s413_s11, 512  }
 0x27a   : > { %634 = vsyncadd (%p502_p8), %s413_s11, 4294966784  ;;  %p18_p10 = scmp.ge.s32.totalorder %s710_s24, 4   ;;  %s859_s18 = smov %s641_s19 }
 0x27b   : > { %s860_s19 = smov %s645_s20  ;;  %s861_s20 = smov %s722_s27 }
 0x27c   : > { %s862_s21 = smov %s710_s24  ;;  %20 = sbr.rel (!%p18_p10) target bundleno = 5 (0x5), region = 85 }
 0x281   :  { %419 = vsyncpa [#allocation3], 1 }
 0x282   :  { %421 = vsyncpa [#allocation3 + $0x1], 1 }
 0x283   :  { %422 = vsyncpa [#allocation4], 1 }
 0x284   :  { %424 = vsyncpa [#allocation4 + $0x1], 1 }

</bundles_post_ra>
